<compile_context>
chip_gen: v7x
topology: tpu7x:2x2x1
jax: 0.10.0
libtpu: 0.0.40
codegen_flags: <defaults>
</compile_context>

<pallas_src>
import jax
import jax.numpy as jnp
from jax.experimental import pallas as pl
from jax.experimental.pallas import tpu as pltpu


# ----------------------------------------------------------------------------- helpers
def _round_up(v, m):
    return (v + m - 1) // m * m


def _cdiv(a, b):
    return -(-a // b)


_DEFAULT_VMEM_CAP = 64 * 1024 * 1024  # conservative default (v7x per-TC VMEM)


def _vmem_budget_bytes(override=None):
    """~80% of this generation's VMEM (headroom for compiler scratch/temps)."""
    if override is not None:
        return int(override)
    cap = _DEFAULT_VMEM_CAP
    try:
        info = pltpu.get_tpu_info()
        for attr in ("vmem_capacity_bytes", "vmem_bytes", "vmem_size_bytes"):
            val = getattr(info, attr, None)
            if val:
                cap = int(val)
                break
    except Exception:
        pass
    return int(cap * 0.8)


# ----------------------------------------------------------------------------- kernels
def _softmax_epilogue(z, o_ref):
    """Numerically stable softmax over the last dim; write to o_ref."""
    z = z - jnp.max(z, axis=-1, keepdims=True)
    e = jnp.exp(z)
    denom = jnp.sum(e, axis=-1, keepdims=True)
    inv = pl.reciprocal(denom, approx=True)       # EUP slot (not a VALU divide)
    inv = inv * (2.0 - denom * inv)               # one Newton step -> exact normalization
    o_ref[...] = (e * inv).astype(o_ref.dtype)


def _softmax_out_single_kernel(x_ref, wt_ref, b_ref, o_ref):
    # x_ref : (TM, H)    tile of flattened inputs
    # wt_ref: (H, Opad)  resident transposed weight (constant index, single-buffered)
    # b_ref : (1, Opad)  f32 bias; padded lanes hold -1e30
    # o_ref : (TM, Opad) lane-dense output tile
    z = jnp.dot(x_ref[...], wt_ref[...], preferred_element_type=jnp.float32)
    _softmax_epilogue(z + b_ref[...], o_ref)


def _softmax_out_ksplit_kernel(x_ref, wt_ref, b_ref, o_ref, acc_ref):
    # Same as above but the hidden (K) dim is a grid axis; acc_ref is an f32
    # VMEM accumulator that persists across the K iterations for a given M tile.
    k = pl.program_id(1)

    @pl.when(k == 0)
    def _():
        acc_ref[...] = jnp.zeros_like(acc_ref)

    acc_ref[...] += jnp.dot(x_ref[...], wt_ref[...],
                            preferred_element_type=jnp.float32)

    @pl.when(k == pl.num_programs(1) - 1)
    def _():
        _softmax_epilogue(acc_ref[...] + b_ref[...], o_ref)


# ----------------------------------------------------------------------------- wrapper
def prepare_softmax_out_params(weight, bias, *, matmul_dtype=None,
                               force_k_split=False, vmem_budget_bytes=None):
    """Hoisted, once-per-module work: transpose/pad/cast the weight, pad the bias,
    and decide single-pass vs K-split tiling for this generation's VMEM."""
    output, hidden = weight.shape
    o_pad = _round_up(output, 128)
    budget = _vmem_budget_bytes(vmem_budget_bytes)

    w_dtype = jnp.dtype(matmul_dtype) if matmul_dtype is not None else jnp.dtype(weight.dtype)
    w_bpe = w_dtype.itemsize
    in_bpe = w_bpe            # x is cast to the same matmul dtype
    out_bpe = 4               # conservative (f32 output) for the sizing decision

    # Single-pass feasibility: resident weight + bias plus at least a 256-row
    # tile of x / out / softmax temporaries must fit the budget.
    fixed_single = hidden * o_pad * w_bpe + 2 * o_pad * 4
    per_row_single = (2 * hidden * in_bpe        # x tile (double-buffered)
                      + 2 * o_pad * out_bpe      # out tile (double-buffered)
                      + 2 * o_pad * 4)           # exp / max-sub f32 temporaries
    max_rows_single = (budget - fixed_single) // per_row_single if budget > fixed_single else 0
    use_k_split = force_k_split or max_rows_single < 256

    if not use_k_split:
        tile_k = hidden
        hidden_pad = hidden
    else:
        # K-split: tile_k must be a multiple of 128 (x block's last dim).
        ref_tile_m = 256
        fixed = (ref_tile_m * o_pad * 4                 # f32 accumulator scratch
                 + 2 * ref_tile_m * o_pad * out_bpe     # out tile
                 + 2 * ref_tile_m * o_pad * 4           # softmax temporaries
                 + 2 * o_pad * 4)                       # bias
        per_k = 2 * ref_tile_m * in_bpe + 2 * o_pad * w_bpe
        if budget > fixed:
            tile_k = max(128, ((budget - fixed) // per_k) // 128 * 128)
        else:
            tile_k = 128
        tile_k = min(tile_k, _round_up(hidden, 128))
        if force_k_split:
            tile_k = min(tile_k, 128)
        hidden_pad = _round_up(hidden, tile_k)

    # Weight: transpose to (hidden, output), zero-pad, cast — once, not per call.
    wt = weight.T.astype(w_dtype)
    if o_pad != output or hidden_pad != hidden:
        wt = jnp.pad(wt, ((0, hidden_pad - hidden), (0, o_pad - output)))
    # Bias built in f32 (-1e30 pad is not representable in narrow dtypes); padded
    # lanes vanish in the softmax (exp underflows to 0).
    b = bias.astype(jnp.float32)
    if o_pad != output:
        b = jnp.concatenate([b, jnp.full((o_pad - output,), -1e30, jnp.float32)])
    b2d = b.reshape(1, o_pad)

    return dict(wt=wt, b2d=b2d, hidden=hidden, hidden_pad=hidden_pad,
                output=output, o_pad=o_pad, tile_k=tile_k,
                use_k_split=use_k_split,
                matmul_dtype=(w_dtype if matmul_dtype is not None else None),
                budget=budget)


def softmax_out_forward(x, weight=None, bias=None, *, params=None, out_dtype=None,
                        target_tile_m=512, matmul_dtype=None,
                        force_k_split=False, vmem_budget_bytes=None):
    """x: (..., hidden); weight: (output, hidden) [PyTorch layout]; bias: (output,)."""
    if params is None:
        params = prepare_softmax_out_params(
            weight, bias, matmul_dtype=matmul_dtype,
            force_k_split=force_k_split, vmem_budget_bytes=vmem_budget_bytes)

    wt, b2d = params["wt"], params["b2d"]
    hidden, hidden_pad = params["hidden"], params["hidden_pad"]
    output, o_pad = params["output"], params["o_pad"]
    tile_k = params["tile_k"]
    use_k_split = params["use_k_split"]
    budget = params["budget"]

    orig_shape = x.shape
    assert orig_shape[-1] == hidden
    out_dtype = jnp.dtype(out_dtype) if out_dtype is not None else jnp.dtype(x.dtype)

    x2d = x.reshape(-1, hidden)
    if params["matmul_dtype"] is not None:
        x2d = x2d.astype(params["matmul_dtype"])
    m = x2d.shape[0]

    in_bpe = jnp.dtype(x2d.dtype).itemsize
    w_bpe = jnp.dtype(wt.dtype).itemsize
    out_bpe = out_dtype.itemsize

    # ---- tile_m: as large as the VMEM budget allows, balanced over m so the
    #      trailing tile is not mostly padding, sublane(8)-aligned.
    if not use_k_split:
        fixed = hidden_pad * o_pad * w_bpe + 2 * o_pad * 4
        per_row = 2 * hidden_pad * in_bpe + 2 * o_pad * out_bpe + 2 * o_pad * 4
    else:
        fixed = 2 * tile_k * o_pad * w_bpe + 2 * o_pad * 4
        per_row = (2 * tile_k * in_bpe + o_pad * 4          # x tiles + acc scratch
                   + 2 * o_pad * out_bpe + 2 * o_pad * 4)   # out tiles + temporaries
    if budget > fixed:
        max_tile_m = max(8, ((budget - fixed) // per_row) // 8 * 8)
    else:
        max_tile_m = 8
    target = max(8, (min(target_tile_m, max_tile_m) // 8) * 8)
    n_tiles_m = _cdiv(m, target)
    tile_m = min(_round_up(_cdiv(m, n_tiles_m), 8), max_tile_m)

    m_pad = _round_up(m, tile_m)
    grid_m = m_pad // tile_m
    grid_k = hidden_pad // tile_k

    pad_m, pad_h = m_pad - m, hidden_pad - hidden
    if pad_m or pad_h:
        x2d = jnp.pad(x2d, ((0, pad_m), (0, pad_h)))

    cost = pl.CostEstimate(
        flops=2 * m_pad * hidden_pad * o_pad,
        transcendentals=m_pad * o_pad,
        bytes_accessed=(m_pad * hidden_pad * in_bpe
                        + hidden_pad * o_pad * w_bpe
                        + o_pad * 4
                        + m_pad * o_pad * out_bpe),
    )

    def launch(single_buffer_const):
        def const_spec(shape, index_map):
            # Constant-index blocks gain nothing from double-buffering; request a
            # single VMEM copy to free budget for larger M tiles.
            if single_buffer_const:
                return pl.BlockSpec(shape, index_map, pipeline_mode=pl.Buffered(1))
            return pl.BlockSpec(shape, index_map)

        if not use_k_split:
            grid_spec = pltpu.PrefetchScalarGridSpec(
                num_scalar_prefetch=0,
                grid=(grid_m,),
                in_specs=[
                    pl.BlockSpec((tile_m, hidden_pad), lambda i: (i, 0)),
                    const_spec((hidden_pad, o_pad), lambda i: (0, 0)),
                    const_spec((1, o_pad), lambda i: (0, 0)),
                ],
                out_specs=pl.BlockSpec((tile_m, o_pad), lambda i: (i, 0)),
            )
            kernel = _softmax_out_single_kernel
            semantics = ("parallel",)
        else:
            grid_spec = pltpu.PrefetchScalarGridSpec(
                num_scalar_prefetch=0,
                grid=(grid_m, grid_k),
                in_specs=[
                    pl.BlockSpec((tile_m, tile_k), lambda i, k: (i, k)),
                    pl.BlockSpec((tile_k, o_pad), lambda i, k: (k, 0)),
                    const_spec((1, o_pad), lambda i, k: (0, 0)),
                ],
                out_specs=pl.BlockSpec((tile_m, o_pad), lambda i, k: (i, 0)),
                scratch_shapes=[pltpu.VMEM((tile_m, o_pad), jnp.float32)],
            )
            kernel = _softmax_out_ksplit_kernel
            semantics = ("parallel", "arbitrary")

        return pl.pallas_call(
            kernel,
            out_shape=jax.ShapeDtypeStruct((m_pad, o_pad), out_dtype),
            grid_spec=grid_spec,
            compiler_params=pltpu.CompilerParams(
                dimension_semantics=semantics,
                vmem_limit_bytes=int(budget),
            ),
            cost_estimate=cost,
        )(x2d, wt, b2d)

    try:
        out2d = launch(single_buffer_const=True)
    except Exception:
        # pl.Buffered(1) on constant-index operands unsupported on this jax
        # version -- fall back to default double-buffering (correctness identical).
        out2d = launch(single_buffer_const=False)

    out2d = out2d[:m, :output]
    return out2d.reshape(*orig_shape[:-1], output)


# ----------------------------------------------------------------------------- test
if __name__ == "__main__":
    key = jax.random.PRNGKey(0)

    # --- Test 1: default exact-f32 path (matches the PyTorch module), single-pass kernel.
    batch, seq, hidden, output = 2, 8, 32, 16
    k1, k2, k3, key = jax.random.split(key, 4)
    x = jax.random.normal(k1, (batch, seq, hidden), dtype=jnp.float32)
    weight = jax.random.normal(k2, (output, hidden), dtype=jnp.float32) * 0.1  # (out, in)
    bias = jax.random.normal(k3, (output,), dtype=jnp.float32) * 0.1

    params = prepare_softmax_out_params(weight, bias)          # hoisted weight prep
    out = jax.block_until_ready(softmax_out_forward(x, params=params))
    ref = jax.nn.softmax(x @ weight.T + bias, axis=-1)
    assert out.shape == (batch, seq, output)
    # Tolerance covers XLA-default vs MXU f32 matmul precision only; the softmax
    # normalization itself is now exact (Newton-refined reciprocal): rows sum to 1.
    assert jnp.allclose(out, ref, atol=2e-3, rtol=2e-3)
    assert jnp.allclose(jnp.sum(out, axis=-1), 1.0, atol=1e-5)

    # --- Test 2: K-split (hidden-axis reduction grid + accumulator) path.
    hidden2, output2 = 256, 48
    k1, k2, k3, key = jax.random.split(key, 4)
    x2 = jax.random.normal(k1, (batch, seq, hidden2), dtype=jnp.float32)
    w2 = jax.random.normal(k2, (output2, hidden2), dtype=jnp.float32) * 0.05
    b2 = jax.random.normal(k3, (output2,), dtype=jnp.float32) * 0.1
    out2 = jax.block_until_ready(softmax_out_forward(x2, w2, b2, force_k_split=True))
    ref2 = jax.nn.softmax(x2 @ w2.T + b2, axis=-1)
    assert out2.shape == (batch, seq, output2)
    assert jnp.allclose(out2, ref2, atol=2e-3, rtol=2e-3)
    assert jnp.allclose(jnp.sum(out2, axis=-1), 1.0, atol=1e-5)

    # --- Test 3: opt-in bf16 matmul operands (f32 accumulation + f32 softmax).
    out3 = jax.block_until_ready(
        softmax_out_forward(x, weight, bias, matmul_dtype=jnp.bfloat16))
    assert jnp.allclose(out3, ref, atol=2e-2, rtol=2e-2)
    assert jnp.allclose(jnp.sum(out3, axis=-1), 1.0, atol=1e-4)

    print("KERNEL_OK")
</pallas_src>

<mosaic_0001>
module attributes {stable_mosaic.version = 11 : i64} {
  func.func @_softmax_out_single_kernel(%arg0: i32, %arg1: memref<16x32xf32, #tpu.memory_space<vmem>>, %arg2: memref<32x128xf32, #tpu.memory_space<vmem>>, %arg3: memref<1x128xf32, #tpu.memory_space<vmem>>, %arg4: memref<16x128xf32, #tpu.memory_space<vmem>>) attributes {dimension_semantics = [#tpu.dimension_semantics<parallel>], iteration_bounds = array<i64: 1>, scalar_prefetch = 0 : i64, scratch_operands = 0 : i64, tpu.core_type = #tpu.core_type<tc>, window_params = [{transform_indices = @transform_0, window_bounds = array<i64: 16, 32>}, {pipeline_mode = #tpu.pipeline_mode<synchronous>, transform_indices = @transform_1, window_bounds = array<i64: 32, 128>}, {pipeline_mode = #tpu.pipeline_mode<synchronous>, transform_indices = @transform_2, window_bounds = array<i64: 1, 128>}, {transform_indices = @transform_3, window_bounds = array<i64: 16, 128>}]} {
    %c0 = arith.constant 0 : index
    %c0_0 = arith.constant 0 : index
    %0 = vector.load %arg1[%c0, %c0_0] : memref<16x32xf32, #tpu.memory_space<vmem>>, vector<16x32xf32>
    %c0_1 = arith.constant 0 : index
    %c0_2 = arith.constant 0 : index
    %1 = vector.load %arg2[%c0_1, %c0_2] : memref<32x128xf32, #tpu.memory_space<vmem>>, vector<32x128xf32>
    %cst = arith.constant dense<0.000000e+00> : vector<16x128xf32>
    %2 = tpu.matmul %0, %1, %cst {dimension_numbers = #tpu.dot_dimension_numbers<[1], [0], [0], [1], [0, 0, 1, 1], [], []>} : vector<16x32xf32>, vector<32x128xf32>, vector<16x128xf32> -> vector<16x128xf32>
    %c0_3 = arith.constant 0 : index
    %c0_4 = arith.constant 0 : index
    %3 = vector.load %arg3[%c0_3, %c0_4] : memref<1x128xf32, #tpu.memory_space<vmem>>, vector<1x128xf32>
    %4 = vector.broadcast %3 : vector<1x128xf32> to vector<16x128xf32>
    %5 = arith.addf %2, %4 : vector<16x128xf32>
    %cst_5 = arith.constant dense<0xFF800000> : vector<16xf32>
    %6 = vector.multi_reduction <maximumf>, %5, %cst_5 [1] : vector<16x128xf32> to vector<16xf32>
    %7 = vector.shape_cast %6 : vector<16xf32> to vector<16x1xf32>
    %8 = vector.broadcast %7 : vector<16x1xf32> to vector<16x128xf32>
    %9 = arith.subf %5, %8 : vector<16x128xf32>
    %10 = math.exp %9 : vector<16x128xf32>
    %cst_6 = arith.constant dense<0.000000e+00> : vector<16xf32>
    %11 = vector.multi_reduction <add>, %10, %cst_6 [1] : vector<16x128xf32> to vector<16xf32>
    %12 = vector.shape_cast %11 : vector<16xf32> to vector<16x1xf32>
    %13 = tpu.reciprocal %12 {approx = true} : vector<16x1xf32> -> vector<16x1xf32>
    %14 = arith.mulf %12, %13 : vector<16x1xf32>
    %cst_7 = arith.constant 2.000000e+00 : f32
    %15 = vector.broadcast %cst_7 : f32 to vector<16x1xf32>
    %16 = arith.subf %15, %14 : vector<16x1xf32>
    %17 = arith.mulf %13, %16 : vector<16x1xf32>
    %18 = vector.broadcast %17 : vector<16x1xf32> to vector<16x128xf32>
    %19 = arith.mulf %10, %18 : vector<16x128xf32>
    %c0_8 = arith.constant 0 : index
    %c0_9 = arith.constant 0 : index
    %20 = vector.load %arg4[%c0_8, %c0_9] : memref<16x128xf32, #tpu.memory_space<vmem>>, vector<16x128xf32>
    tpu.vector_store %arg4[%c0_8, %c0_9], %19 {strides = array<i32>} : memref<16x128xf32, #tpu.memory_space<vmem>>, vector<16x128xf32>,
    return
  }
  func.func @transform_0(%arg0: i32) -> (i32, i32) {
    %c0_i32 = arith.constant 0 : i32
    %c0_i32_0 = arith.constant 0 : i32
    return %arg0, %c0_i32 : i32, i32
  }
  func.func @transform_1(%arg0: i32) -> (i32, i32) {
    %c0_i32 = arith.constant 0 : i32
    %c0_i32_0 = arith.constant 0 : i32
    %c0_i32_1 = arith.constant 0 : i32
    return %c0_i32, %c0_i32_0 : i32, i32
  }
  func.func @transform_2(%arg0: i32) -> (i32, i32) {
    %c0_i32 = arith.constant 0 : i32
    %c0_i32_0 = arith.constant 0 : i32
    %c0_i32_1 = arith.constant 0 : i32
    return %c0_i32, %c0_i32_0 : i32, i32
  }
  func.func @transform_3(%arg0: i32) -> (i32, i32) {
    %c0_i32 = arith.constant 0 : i32
    %c0_i32_0 = arith.constant 0 : i32
    return %arg0, %c0_i32 : i32, i32
  }
}

module attributes {stable_mosaic.version = 11 : i64} {
  func.func @_softmax_out_single_kernel(%arg0: i32, %arg1: memref<16x32xf32, #tpu.memory_space<vmem>>, %arg2: memref<32x128xf32, #tpu.memory_space<vmem>>, %arg3: memref<1x128xf32, #tpu.memory_space<vmem>>, %arg4: memref<16x128xf32, #tpu.memory_space<vmem>>) attributes {dimension_semantics = [#tpu.dimension_semantics<parallel>], iteration_bounds = array<i64: 1>, scalar_prefetch = 0 : i64, scratch_operands = 0 : i64, tpu.core_type = #tpu.core_type<tc>, window_params = [{transform_indices = @transform_0, window_bounds = array<i64: 16, 32>}, {pipeline_mode = #tpu.pipeline_mode<synchronous>, transform_indices = @transform_1, window_bounds = array<i64: 32, 128>}, {pipeline_mode = #tpu.pipeline_mode<synchronous>, transform_indices = @transform_2, window_bounds = array<i64: 1, 128>}, {transform_indices = @transform_3, window_bounds = array<i64: 16, 128>}]} {
    %c0 = arith.constant 0 : index
    %c0_0 = arith.constant 0 : index
    %0 = vector.load %arg1[%c0, %c0_0] : memref<16x32xf32, #tpu.memory_space<vmem>>, vector<16x32xf32>
    %c0_1 = arith.constant 0 : index
    %c0_2 = arith.constant 0 : index
    %1 = vector.load %arg2[%c0_1, %c0_2] : memref<32x128xf32, #tpu.memory_space<vmem>>, vector<32x128xf32>
    %cst = arith.constant dense<0.000000e+00> : vector<16x128xf32>
    %2 = tpu.matmul %0, %1, %cst {dimension_numbers = #tpu.dot_dimension_numbers<[1], [0], [0], [1], [0, 0, 1, 1], [], []>} : vector<16x32xf32>, vector<32x128xf32>, vector<16x128xf32> -> vector<16x128xf32>
    %c0_3 = arith.constant 0 : index
    %c0_4 = arith.constant 0 : index
    %3 = vector.load %arg3[%c0_3, %c0_4] : memref<1x128xf32, #tpu.memory_space<vmem>>, vector<1x128xf32>
    %4 = vector.broadcast %3 : vector<1x128xf32> to vector<16x128xf32>
    %5 = arith.addf %2, %4 : vector<16x128xf32>
    %cst_5 = arith.constant dense<0xFF800000> : vector<16xf32>
    %6 = vector.multi_reduction <maximumf>, %5, %cst_5 [1] : vector<16x128xf32> to vector<16xf32>
    %7 = vector.shape_cast %6 : vector<16xf32> to vector<16x1xf32>
    %8 = vector.broadcast %7 : vector<16x1xf32> to vector<16x128xf32>
    %9 = arith.subf %5, %8 : vector<16x128xf32>
    %10 = math.exp %9 : vector<16x128xf32>
    %cst_6 = arith.constant dense<0.000000e+00> : vector<16xf32>
    %11 = vector.multi_reduction <add>, %10, %cst_6 [1] : vector<16x128xf32> to vector<16xf32>
    %12 = vector.shape_cast %11 : vector<16xf32> to vector<16x1xf32>
    %13 = tpu.reciprocal %12 {approx = true} : vector<16x1xf32> -> vector<16x1xf32>
    %14 = arith.mulf %12, %13 : vector<16x1xf32>
    %cst_7 = arith.constant 2.000000e+00 : f32
    %15 = vector.broadcast %cst_7 : f32 to vector<16x1xf32>
    %16 = arith.subf %15, %14 : vector<16x1xf32>
    %17 = arith.mulf %13, %16 : vector<16x1xf32>
    %18 = vector.broadcast %17 : vector<16x1xf32> to vector<16x128xf32>
    %19 = arith.mulf %10, %18 : vector<16x128xf32>
    %c0_8 = arith.constant 0 : index
    %c0_9 = arith.constant 0 : index
    %20 = vector.load %arg4[%c0_8, %c0_9] : memref<16x128xf32, #tpu.memory_space<vmem>>, vector<16x128xf32>
    tpu.vector_store %arg4[%c0_8, %c0_9], %19 {strides = array<i32>} : memref<16x128xf32, #tpu.memory_space<vmem>>, vector<16x128xf32>,
    return
  }
  func.func @transform_0(%arg0: i32) -> (i32, i32) {
    %c0_i32 = arith.constant 0 : i32
    %c0_i32_0 = arith.constant 0 : i32
    return %arg0, %c0_i32 : i32, i32
  }
  func.func @transform_1(%arg0: i32) -> (i32, i32) {
    %c0_i32 = arith.constant 0 : i32
    %c0_i32_0 = arith.constant 0 : i32
    %c0_i32_1 = arith.constant 0 : i32
    return %c0_i32, %c0_i32_0 : i32, i32
  }
  func.func @transform_2(%arg0: i32) -> (i32, i32) {
    %c0_i32 = arith.constant 0 : i32
    %c0_i32_0 = arith.constant 0 : i32
    %c0_i32_1 = arith.constant 0 : i32
    return %c0_i32, %c0_i32_0 : i32, i32
  }
  func.func @transform_3(%arg0: i32) -> (i32, i32) {
    %c0_i32 = arith.constant 0 : i32
    %c0_i32_0 = arith.constant 0 : i32
    return %arg0, %c0_i32 : i32, i32
  }
}

</mosaic_0001>

<bundles_post_ra>
// kernel: tpu_custom_call.1
= control target key start
LH: loop header
LB: loop body
LE: loop exit
PB: predicated region body
PF: predicated region fallthrough
CT: control target
= control target key end

     0   :  { %8 = vsyncpa [#allocation3], 0  ;;  %s368_s0 = inlined_call_operand.hbm [shape: f32[16,32], index: 0, kind: input, shape index: {}]   ;;  %s369_s1 = inlined_call_operand.hbm [shape: f32[32,128], index: 1, kind: input, shape index: {}]   ;;  %s370_s2 = inlined_call_operand.vmem [shape: f32[1,128], index: 2, kind: input, shape index: {}]   ;;  %s371_s3 = inlined_call_operand.hbm [shape: f32[16,128], index: 3, kind: output, shape index: {}]  }
   0x1   :  { %9 = vsyncpa [#allocation6], 0 }
   0x2   :  { %10 = vsyncpa [#allocation4], 0  ;;  %s295_s12 = smov [#allocation2]   ;;  %s223_s16 = scalar_lea.hbm %s368_s0, 256 }
   0x3   :  { %s16_s13 = sshll.u32 %s295_s12, 4  ;;  %p224_p0 = scmp.ne.s32.totalorder %s368_s0, %s223_s16  ;;  %s17_s13 = int_to_ptr.vmem [resolvable:$true] %s16_s13 }
   0x4   :  { %p227_p1 = scmp.lt.u32.totalorder %s223_s16, %s368_s0 }
   0x6   :  { %p229_p2 = pnand %p227_p1, %p224_p0 }
   0x8   :  { %232 = shalt.err (!%p229_p2)
}
   0x9   :  { %s233_s21 = scalar_lea.vmem %s17_s13, 256  ;;  %p238_p4 = scmp.lt.s32.totalorder %s17_s13, %s17_s13 }
   0xa   :  { %p234_p3 = scmp.ne.s32.totalorder %s17_s13, %s233_s21  ;;  %p239_p5 = scmp.lt.s32.totalorder %s233_s21, %s233_s21 }
   0xc   :  { %p240_p6 = por %p239_p5, %p238_p4 }
   0xe   :  { %p241_p7 = pnand %p240_p6, %p234_p3 }
  0x10   :  { %244 = shalt.err (!%p241_p7)
}
  0x11   :  { %s296_s22 = smov 128   ;;  %s297_s23 = smov 8  }
  0x12   :  { %22 = dma.hbm_to_vmem [thread:$0]  %s368_s0, 256, %s17_s13, [#allocation3], %s296_s22, %s296_s22, %s297_s23  }
  0x13   :  { %s298_s26 = smov [#allocation5]   ;;  %s245_s30 = scalar_lea.hbm %s369_s1, 512 }
  0x14   :  { %s28_s27 = sshll.u32 %s298_s26, 4  ;;  %p246_p8 = scmp.ne.s32.totalorder %s369_s1, %s245_s30  ;;  %s29_s27 = int_to_ptr.vmem [resolvable:$true] %s28_s27 }
  0x15   :  { %p249_p9 = scmp.lt.u32.totalorder %s245_s30, %s369_s1 }
  0x17   :  { %p251_p10 = pnand %p249_p9, %p246_p8 }
  0x19   :  { %254 = shalt.err (!%p251_p10)
}
  0x1a   :  { %s255_s8 = scalar_lea.vmem %s29_s27, 512  ;;  %p260_p12 = scmp.lt.s32.totalorder %s29_s27, %s29_s27 }
  0x1b   :  { %p256_p11 = scmp.ne.s32.totalorder %s29_s27, %s255_s8  ;;  %p261_p13 = scmp.lt.s32.totalorder %s255_s8, %s255_s8 }
  0x1d   :  { %p262_p0 = por %p261_p13, %p260_p12 }
  0x1f   :  { %p263_p1 = pnand %p262_p0, %p256_p11 }
  0x21   :  { %266 = shalt.err (!%p263_p1)
}
  0x22   :  { %34 = dma.hbm_to_vmem [thread:$0]  %s369_s1, 512, %s29_s27, [#allocation6], %s296_s22, %s296_s22, %s297_s23  }
  0x23   :  { %289 = dma.done.wait [#allocation3], 256  }
  0x24   :  { %290 = vsyncadd [#allocation3], 4294967040 }
  0x25   :  { %291 = dma.done.wait [#allocation6], 512  }
  0x26   :  { %292 = vsyncadd [#allocation6], 4294966784  ;;  %vm56_vm0 = vcmask 261120   ;;  %v45_v0 = vld [vmem:[#allocation5] sm:$0xff]  ;;  %v46_v1 = vld [vmem:[#allocation5 + $0x8] sm:$0xff] }
  0x27   :  { %v47_v2 = vld [vmem:[#allocation5 + $0x10] sm:$0xff]  ;;  %v202_v3 = vpack.c.bf16 %v46_v1, %v45_v0  ;;  %v48_v4 = vld [vmem:[#allocation5 + $0x18] sm:$0xff] }
  0x28   :  { %v43_v5 = vld [vmem:[#allocation2] sm:$0xff]  ;;  %v206_v6 = vpack.c.bf16 %v48_v4, %v47_v2  ;;  %v44_v7 = vld [vmem:[#allocation2 + $0x8] sm:$0xff] }
  0x29   :  { %199 = vmatprep.mubr.msk.f32.mxu0 %vm56_vm0, %v43_v5  ;;  %203 = vmatprep.subr.bf16.mxu0 %v202_v3  ;;  %v182_v8 = vld [vmem:[%s370_s2] ss:$0 sm:$0xff]  ;;  %s299_s2 = smov [#allocation7]  }
  0x2a   :  { %205 = vmatpush3.bf16.msra.mxu0 %v202_v3  ;;  %s169_s11 = sshll.u32 %s299_s2, 4  ;;  %s170_s11 = int_to_ptr.vmem [resolvable:$true] %s169_s11 }
  0x2b   :  { %207 = vmatprep.subr.bf16.mxu0 %v206_v6  ;;  %s267_s12 = scalar_lea.vmem %s170_s11, 256  ;;  %p272_p3 = scmp.lt.s32.totalorder %s170_s11, %s170_s11 }
  0x2c   :  { %p268_p2 = scmp.ne.s32.totalorder %s170_s11, %s267_s12  ;;  %p273_p4 = scmp.lt.s32.totalorder %s267_s12, %s267_s12 }
  0x2e   :  { %209 = vmatpush3.bf16.msra.mxu0 %v206_v6  ;;  %p274_p5 = por %p273_p4, %p272_p3 }
  0x30   :  { %p275_p6 = pnand %p274_p5, %p268_p2 }
  0x31   :  { %200 = vmatmul.mubr.msk.f32.vlgmr.msra.gmra.mrb[0].mxu0 %vm56_vm0, %v44_v7 }
 0x104   :  { %v201_v9 = vpop.f32.mrb[0].mxu0 }
 0x105   :  { %v129_v10 = vpop.f32.mrb[1].mxu0  ;;  %v135_v12 = vadd.f32 %v201_v9, %v182_v8 }
 0x106   :  { %v130_v11 = vadd.f32 %v182_v8, %v129_v10 }
 0x108   :  { %138 = vmax.xlane.f32.xlu0 %v130_v11 }
 0x10c   :  { %140 = vmax.xlane.f32.xlu0 %v135_v12 }
 0x195   :  { %v139_v13 = vpop.xlane.xlu0 %138 }
 0x196   :  { %v142_v14 = vsub.f32 %v130_v11, %v139_v13 }
 0x198   :  { %v144_v15 = vmul.f32 1.442695, %v142_v14 }
 0x199   :  { %v141_v16 = vpop.xlane.xlu0 %140 }
 0x19a   :  { %215 = vpow2.f32 %v144_v15  ;;  %v143_v17 = vsub.f32 %v135_v12, %v141_v16 }
 0x19c   :  { %v146_v18 = vmul.f32 1.442695, %v143_v17 }
 0x19e   :  { %217 = vpow2.f32 %v146_v18 }
 0x1a4   :  { %v216_v19 = vpop.eup %215 }
 0x1a5   :  { %148 = vadd.xlane.f32.xlu1 %v216_v19 }
 0x1a8   :  { %v218_v20 = vpop.eup %217 }
 0x1a9   :  { %150 = vadd.xlane.f32.xlu1 %v218_v20 }
 0x232   :  { %v149_v21 = vpop.xlane.xlu1 %148 }
 0x233   :  { %219 = vrcp.f32 %v149_v21 }
 0x236   :  { %v151_v22 = vpop.xlane.xlu1 %150 }
 0x237   :  { %221 = vrcp.f32 %v151_v22 }
 0x23d   :  { %v220_v23 = vpop.eup %219 }
 0x23e   :  { %v154_v24 = vmul.f32 %v220_v23, %v149_v21 }
 0x240   :  { %v156_v25 = vsub.f32 2.0, %v154_v24 }
 0x241   :  { %v222_v26 = vpop.eup %221 }
 0x242   :  { %v158_v27 = vmul.f32 %v220_v23, %v156_v25  ;;  %v155_v28 = vmul.f32 %v222_v26, %v151_v22 }
 0x244   :  { %v157_v29 = vsub.f32 2.0, %v155_v28  ;;  %v160_v30 = vmul.f32 %v216_v19, %v158_v27 }
 0x246   :  { %v159_v31 = vmul.f32 %v222_v26, %v157_v29  ;;  %162 = vst [vmem:[#allocation7] sm:$0xff] %v160_v30 }
 0x248   :  { %v161_v32 = vmul.f32 %v218_v20, %v159_v31 }
 0x24a   :  { %163 = vst [vmem:[#allocation7 + $0x8] sm:$0xff] %v161_v32 }
 0x24b   :  { %278 = shalt.err (!%p275_p6)
}
 0x24c   :  { %s279_s15 = scalar_lea.hbm %s371_s3, 256 }
 0x24d   :  { %p280_p7 = scmp.ne.s32.totalorder %s371_s3, %s279_s15  ;;  %p283_p8 = scmp.lt.u32.totalorder %s279_s15, %s371_s3 }
 0x24f   :  { %p285_p9 = pnand %p283_p8, %p280_p7 }
 0x251   :  { %288 = shalt.err (!%p285_p9)
}
 0x252   :  { %175 = dma.vmem_to_hbm [thread:$0]  %s170_s11, 256, %s371_s3, [#allocation4], %s296_s22, %s296_s22, %s297_s23  }
 0x253   :  { %293 = dma.done.wait [#allocation4], 256  }
 0x254   :  { %294 = vsyncadd [#allocation4], 4294967040 }
 0x255   :  { %179 = vsyncpa [#allocation3], 1 }
 0x256   :  { %180 = vsyncpa [#allocation6], 1 }
 0x257   :  { %181 = vsyncpa [#allocation4], 1 }

// kernel: tpu_custom_call.1
= control target key start
LH: loop header
LB: loop body
LE: loop exit
PB: predicated region body
PF: predicated region fallthrough
CT: control target
= control target key end

     0   :  { %8 = vsyncpa [#allocation3], 0  ;;  %s368_s0 = inlined_call_operand.hbm [shape: f32[16,32], index: 0, kind: input, shape index: {}]   ;;  %s369_s1 = inlined_call_operand.hbm [shape: f32[32,128], index: 1, kind: input, shape index: {}]   ;;  %s370_s2 = inlined_call_operand.vmem [shape: f32[1,128], index: 2, kind: input, shape index: {}]   ;;  %s371_s3 = inlined_call_operand.hbm [shape: f32[16,128], index: 3, kind: output, shape index: {}]  }
   0x1   :  { %9 = vsyncpa [#allocation6], 0 }
   0x2   :  { %10 = vsyncpa [#allocation4], 0  ;;  %s295_s12 = smov [#allocation2]   ;;  %s223_s16 = scalar_lea.hbm %s368_s0, 256 }
   0x3   :  { %s16_s13 = sshll.u32 %s295_s12, 4  ;;  %p224_p0 = scmp.ne.s32.totalorder %s368_s0, %s223_s16  ;;  %s17_s13 = int_to_ptr.vmem [resolvable:$true] %s16_s13 }
   0x4   :  { %p227_p1 = scmp.lt.u32.totalorder %s223_s16, %s368_s0 }
   0x6   :  { %p229_p2 = pnand %p227_p1, %p224_p0 }
   0x8   :  { %232 = shalt.err (!%p229_p2)
}
   0x9   :  { %s233_s21 = scalar_lea.vmem %s17_s13, 256  ;;  %p238_p4 = scmp.lt.s32.totalorder %s17_s13, %s17_s13 }
   0xa   :  { %p234_p3 = scmp.ne.s32.totalorder %s17_s13, %s233_s21  ;;  %p239_p5 = scmp.lt.s32.totalorder %s233_s21, %s233_s21 }
   0xc   :  { %p240_p6 = por %p239_p5, %p238_p4 }
   0xe   :  { %p241_p7 = pnand %p240_p6, %p234_p3 }
  0x10   :  { %244 = shalt.err (!%p241_p7)
}
  0x11   :  { %s296_s22 = smov 128   ;;  %s297_s23 = smov 8  }
  0x12   :  { %22 = dma.hbm_to_vmem [thread:$0]  %s368_s0, 256, %s17_s13, [#allocation3], %s296_s22, %s296_s22, %s297_s23  }
  0x13   :  { %s298_s26 = smov [#allocation5]   ;;  %s245_s30 = scalar_lea.hbm %s369_s1, 512 }
  0x14   :  { %s28_s27 = sshll.u32 %s298_s26, 4  ;;  %p246_p8 = scmp.ne.s32.totalorder %s369_s1, %s245_s30  ;;  %s29_s27 = int_to_ptr.vmem [resolvable:$true] %s28_s27 }
  0x15   :  { %p249_p9 = scmp.lt.u32.totalorder %s245_s30, %s369_s1 }
  0x17   :  { %p251_p10 = pnand %p249_p9, %p246_p8 }
  0x19   :  { %254 = shalt.err (!%p251_p10)
}
  0x1a   :  { %s255_s8 = scalar_lea.vmem %s29_s27, 512  ;;  %p260_p12 = scmp.lt.s32.totalorder %s29_s27, %s29_s27 }
  0x1b   :  { %p256_p11 = scmp.ne.s32.totalorder %s29_s27, %s255_s8  ;;  %p261_p13 = scmp.lt.s32.totalorder %s255_s8, %s255_s8 }
  0x1d   :  { %p262_p0 = por %p261_p13, %p260_p12 }
  0x1f   :  { %p263_p1 = pnand %p262_p0, %p256_p11 }
  0x21   :  { %266 = shalt.err (!%p263_p1)
}
  0x22   :  { %34 = dma.hbm_to_vmem [thread:$0]  %s369_s1, 512, %s29_s27, [#allocation6], %s296_s22, %s296_s22, %s297_s23  }
  0x23   :  { %289 = dma.done.wait [#allocation3], 256  }
  0x24   :  { %290 = vsyncadd [#allocation3], 4294967040 }
  0x25   :  { %291 = dma.done.wait [#allocation6], 512  }
  0x26   :  { %292 = vsyncadd [#allocation6], 4294966784  ;;  %vm56_vm0 = vcmask 261120   ;;  %v45_v0 = vld [vmem:[#allocation5] sm:$0xff]  ;;  %v46_v1 = vld [vmem:[#allocation5 + $0x8] sm:$0xff] }
  0x27   :  { %v47_v2 = vld [vmem:[#allocation5 + $0x10] sm:$0xff]  ;;  %v202_v3 = vpack.c.bf16 %v46_v1, %v45_v0  ;;  %v48_v4 = vld [vmem:[#allocation5 + $0x18] sm:$0xff] }
  0x28   :  { %v43_v5 = vld [vmem:[#allocation2] sm:$0xff]  ;;  %v206_v6 = vpack.c.bf16 %v48_v4, %v47_v2  ;;  %v44_v7 = vld [vmem:[#allocation2 + $0x8] sm:$0xff] }
  0x29   :  { %199 = vmatprep.mubr.msk.f32.mxu0 %vm56_vm0, %v43_v5  ;;  %203 = vmatprep.subr.bf16.mxu0 %v202_v3  ;;  %v182_v8 = vld [vmem:[%s370_s2] ss:$0 sm:$0xff]  ;;  %s299_s2 = smov [#allocation7]  }
  0x2a   :  { %205 = vmatpush3.bf16.msra.mxu0 %v202_v3  ;;  %s169_s11 = sshll.u32 %s299_s2, 4  ;;  %s170_s11 = int_to_ptr.vmem [resolvable:$true] %s169_s11 }
  0x2b   :  { %207 = vmatprep.subr.bf16.mxu0 %v206_v6  ;;  %s267_s12 = scalar_lea.vmem %s170_s11, 256  ;;  %p272_p3 = scmp.lt.s32.totalorder %s170_s11, %s170_s11 }
  0x2c   :  { %p268_p2 = scmp.ne.s32.totalorder %s170_s11, %s267_s12  ;;  %p273_p4 = scmp.lt.s32.totalorder %s267_s12, %s267_s12 }
  0x2e   :  { %209 = vmatpush3.bf16.msra.mxu0 %v206_v6  ;;  %p274_p5 = por %p273_p4, %p272_p3 }
  0x30   :  { %p275_p6 = pnand %p274_p5, %p268_p2 }
  0x31   :  { %200 = vmatmul.mubr.msk.f32.vlgmr.msra.gmra.mrb[0].mxu0 %vm56_vm0, %v44_v7 }
 0x104   :  { %v201_v9 = vpop.f32.mrb[0].mxu0 }
 0x105   :  { %v129_v10 = vpop.f32.mrb[1].mxu0  ;;  %v135_v12 = vadd.f32 %v201_v9, %v182_v8 }
 0x106   :  { %v130_v11 = vadd.f32 %v182_v8, %v129_v10 }
 0x108   :  { %138 = vmax.xlane.f32.xlu0 %v130_v11 }
 0x10c   :  { %140 = vmax.xlane.f32.xlu0 %v135_v12 }
 0x195   :  { %v139_v13 = vpop.xlane.xlu0 %138 }
 0x196   :  { %v142_v14 = vsub.f32 %v130_v11, %v139_v13 }
 0x198   :  { %v144_v15 = vmul.f32 1.442695, %v142_v14 }
 0x199   :  { %v141_v16 = vpop.xlane.xlu0 %140 }
 0x19a   :  { %215 = vpow2.f32 %v144_v15  ;;  %v143_v17 = vsub.f32 %v135_v12, %v141_v16 }
 0x19c   :  { %v146_v18 = vmul.f32 1.442695, %v143_v17 }
 0x19e   :  { %217 = vpow2.f32 %v146_v18 }
 0x1a4   :  { %v216_v19 = vpop.eup %215 }
 0x1a5   :  { %148 = vadd.xlane.f32.xlu1 %v216_v19 }
 0x1a8   :  { %v218_v20 = vpop.eup %217 }
 0x1a9   :  { %150 = vadd.xlane.f32.xlu1 %v218_v20 }
 0x232   :  { %v149_v21 = vpop.xlane.xlu1 %148 }
 0x233   :  { %219 = vrcp.f32 %v149_v21 }
 0x236   :  { %v151_v22 = vpop.xlane.xlu1 %150 }
 0x237   :  { %221 = vrcp.f32 %v151_v22 }
 0x23d   :  { %v220_v23 = vpop.eup %219 }
 0x23e   :  { %v154_v24 = vmul.f32 %v220_v23, %v149_v21 }
 0x240   :  { %v156_v25 = vsub.f32 2.0, %v154_v24 }
 0x241   :  { %v222_v26 = vpop.eup %221 }
 0x242   :  { %v158_v27 = vmul.f32 %v220_v23, %v156_v25  ;;  %v155_v28 = vmul.f32 %v222_v26, %v151_v22 }
 0x244   :  { %v157_v29 = vsub.f32 2.0, %v155_v28  ;;  %v160_v30 = vmul.f32 %v216_v19, %v158_v27 }
 0x246   :  { %v159_v31 = vmul.f32 %v222_v26, %v157_v29  ;;  %162 = vst [vmem:[#allocation7] sm:$0xff] %v160_v30 }
 0x248   :  { %v161_v32 = vmul.f32 %v218_v20, %v159_v31 }
 0x24a   :  { %163 = vst [vmem:[#allocation7 + $0x8] sm:$0xff] %v161_v32 }
 0x24b   :  { %278 = shalt.err (!%p275_p6)
}
 0x24c   :  { %s279_s15 = scalar_lea.hbm %s371_s3, 256 }
 0x24d   :  { %p280_p7 = scmp.ne.s32.totalorder %s371_s3, %s279_s15  ;;  %p283_p8 = scmp.lt.u32.totalorder %s279_s15, %s371_s3 }
 0x24f   :  { %p285_p9 = pnand %p283_p8, %p280_p7 }
 0x251   :  { %288 = shalt.err (!%p285_p9)
}
 0x252   :  { %175 = dma.vmem_to_hbm [thread:$0]  %s170_s11, 256, %s371_s3, [#allocation4], %s296_s22, %s296_s22, %s297_s23  }
 0x253   :  { %293 = dma.done.wait [#allocation4], 256  }
 0x254   :  { %294 = vsyncadd [#allocation4], 4294967040 }
 0x255   :  { %179 = vsyncpa [#allocation3], 1 }
 0x256   :  { %180 = vsyncpa [#allocation6], 1 }
 0x257   :  { %181 = vsyncpa [#allocation4], 1 }

</bundles_post_ra>
